<compile_context>
chip_gen: v7x
topology: tpu7x:2x2x1
jax: 0.10.0
libtpu: 0.0.40
codegen_flags: <defaults>
</compile_context>

<pallas_src>
import jax
import jax.numpy as jnp
from jax.experimental import pallas as pl
from jax.experimental.pallas import tpu as pltpu


def mlp_kernel(x_ref, w1_ref, b1_ref, w2_ref, b2_ref, out_ref, acc_ref):
    k = pl.program_id(0)

    @pl.when(k == 0)
    def _():
        # Init accumulator with the broadcast fc1 bias (saves a VPU add later).
        acc_ref[...] = jnp.broadcast_to(b1_ref[...], acc_ref.shape)

    # fc1 partial product for this K-tile: bf16 operands, f32 accumulation (MXU).
    acc_ref[...] += jnp.dot(
        x_ref[...], w1_ref[...], preferred_element_type=jnp.float32
    )

    @pl.when(k == pl.num_programs(0) - 1)
    def _():
        # ReLU in f32 (VPU), then the small fc3_lab matmul (bf16 in, f32 accum)
        # and the (lane-padded) bias add.  Output block is lane-dense (Cp=128).
        h = jnp.maximum(acc_ref[...], 0.0)
        logits = (
            jnp.dot(h.astype(w2_ref.dtype), w2_ref[...],
                    preferred_element_type=jnp.float32)
            + b2_ref[...]
        )
        out_ref[...] = logits.astype(out_ref.dtype)


def mlp_forward(x, w1, b1, w2, b2, *, tk=None):
    """x: (B, S, F) or (B, D_in) f32.  Returns (B, num_classes) f32 logits."""
    B = x.shape[0]
    x2d = x.reshape(B, -1)                       # x.view(x.size(0), -1)
    D_in, H = w1.shape
    _, C = w2.shape
    assert x2d.shape[1] == D_in

    # Collapse the K grid by default: the full working set fits VMEM easily for the
    # shapes this module uses (D_in <= 64*263, H <= 256), on every TPU generation.
    if tk is None:
        tk = D_in
    assert D_in % tk == 0, "tk must divide the flattened input size"
    # TODO(synk): if a ragged D_in ever appears, switch to pl.cdiv + masked last tile.

    # Lane-dense output: pad num_classes up to a multiple of 128 so the final store
    # is an unmasked full-lane vst; the padded logit columns are sliced off below.
    LANE = 128
    Cp = ((C + LANE - 1) // LANE) * LANE
    w2p = jnp.zeros((H, Cp), w2.dtype).at[:, :C].set(w2)
    b2p = jnp.zeros((1, Cp), jnp.float32).at[0, :C].set(b2.astype(jnp.float32))
    b1_2d = b1.reshape(1, H).astype(jnp.float32)

    # bf16 matmul operands (f32 accumulation in-kernel). Halves the W1/x HBM traffic;
    # the kernel is W1-bandwidth bound at small batch.
    x_bf = x2d.astype(jnp.bfloat16)
    w1_bf = w1.astype(jnp.bfloat16)
    w2p_bf = w2p.astype(jnp.bfloat16)

    grid = (D_in // tk,)
    out_padded = pl.pallas_call(
        mlp_kernel,
        out_shape=jax.ShapeDtypeStruct((B, Cp), jnp.float32),
        grid_spec=pltpu.PrefetchScalarGridSpec(
            num_scalar_prefetch=0,
            grid=grid,
            in_specs=[
                pl.BlockSpec((B, tk), lambda k: (0, k)),    # x K-tile (bf16)
                pl.BlockSpec((tk, H), lambda k: (k, 0)),    # W1 K-tile (bf16)
                pl.BlockSpec((1, H), lambda k: (0, 0)),     # b1 (resident, f32)
                pl.BlockSpec((H, Cp), lambda k: (0, 0)),    # W2 (resident, padded, bf16)
                pl.BlockSpec((1, Cp), lambda k: (0, 0)),    # b2 (resident, padded, f32)
            ],
            out_specs=pl.BlockSpec((B, Cp), lambda k: (0, 0)),
            scratch_shapes=[pltpu.VMEM((B, H), jnp.float32)],
        ),
        compiler_params=pltpu.CompilerParams(
            dimension_semantics=("arbitrary",),  # K-reduction axis (size 1 by default)
        ),
    )(x_bf, w1_bf, b1_2d, w2p_bf, b2p)

    return out_padded[:, :C]


def mlp_reference(x, w1, b1, w2, b2):
    """Pure-JAX reference matching the kernel's bf16-operand / f32-accum numerics."""
    x2d = x.reshape(x.shape[0], -1)
    xf = x2d.astype(jnp.bfloat16).astype(jnp.float32)
    w1f = w1.astype(jnp.bfloat16).astype(jnp.float32)
    w2f = w2.astype(jnp.bfloat16).astype(jnp.float32)
    h = jnp.maximum(xf @ w1f + b1, 0.0)
    hf = h.astype(jnp.bfloat16).astype(jnp.float32)
    return hf @ w2f + b2


if __name__ == "__main__":
    # Small shapes consistent with the module: flattened input -> fc1(H=256) -> ReLU
    # -> fc3_lab(num_classes=13).  (Full model uses D_in = 64*263; here 8*64 = 512.)
    B, S, F = 4, 8, 64          # flattened input_size = S * F = 512
    D_in = S * F
    H = 256                     # hidden_size1
    C = 13                      # num_classes

    key = jax.random.PRNGKey(0)
    kx, kw1, kb1, kw2, kb2 = jax.random.split(key, 5)

    x = jax.random.normal(kx, (B, S, F), dtype=jnp.float32)
    # Deterministic parameter init (uniform, roughly PyTorch's default scale).
    w1 = jax.random.uniform(kw1, (D_in, H), jnp.float32, -1.0, 1.0) / jnp.sqrt(D_in)
    b1 = jax.random.uniform(kb1, (H,), jnp.float32, -1.0, 1.0) / jnp.sqrt(D_in)
    w2 = jax.random.uniform(kw2, (H, C), jnp.float32, -1.0, 1.0) / jnp.sqrt(H)
    b2 = jax.random.uniform(kb2, (C,), jnp.float32, -1.0, 1.0) / jnp.sqrt(H)

    out = mlp_forward(x, w1, b1, w2, b2)
    out = jax.block_until_ready(out)

    ref = mlp_reference(x, w1, b1, w2, b2)
    assert out.shape == (B, C)
    assert jnp.allclose(out, ref, atol=1e-2, rtol=1e-2), "mismatch vs reference"

    print("KERNEL_OK")
</pallas_src>

<mosaic_0001>
module attributes {stable_mosaic.version = 11 : i64} {
  func.func @mlp_kernel(%arg0: i32, %arg1: memref<4x512xbf16, #tpu.memory_space<vmem>>, %arg2: memref<512x256xbf16, #tpu.memory_space<vmem>>, %arg3: memref<1x256xf32, #tpu.memory_space<vmem>>, %arg4: memref<256x128xbf16, #tpu.memory_space<vmem>>, %arg5: memref<1x128xf32, #tpu.memory_space<vmem>>, %arg6: memref<4x128xf32, #tpu.memory_space<vmem>>, %arg7: memref<4x256xf32, #tpu.memory_space<vmem>>) attributes {dimension_semantics = [#tpu.dimension_semantics<arbitrary>], iteration_bounds = array<i64: 1>, scalar_prefetch = 0 : i64, scratch_operands = 1 : i64, tpu.core_type = #tpu.core_type<tc>, window_params = [{transform_indices = @transform_0, window_bounds = array<i64: 4, 512>}, {transform_indices = @transform_1, window_bounds = array<i64: 512, 256>}, {pipeline_mode = #tpu.pipeline_mode<synchronous>, transform_indices = @transform_2, window_bounds = array<i64: 1, 256>}, {pipeline_mode = #tpu.pipeline_mode<synchronous>, transform_indices = @transform_3, window_bounds = array<i64: 256, 128>}, {pipeline_mode = #tpu.pipeline_mode<synchronous>, transform_indices = @transform_4, window_bounds = array<i64: 1, 128>}, {pipeline_mode = #tpu.pipeline_mode<synchronous>, transform_indices = @transform_5, window_bounds = array<i64: 4, 128>}]} {
    %c0_i32 = arith.constant 0 : i32
    %0 = arith.cmpi eq, %arg0, %c0_i32 : i32
    %1 = arith.extui %0 : i1 to i32
    %c0_i32_0 = arith.constant 0 : i32
    %2 = arith.cmpi ne, %1, %c0_i32_0 : i32
    scf.if %2 {
      %c0_10 = arith.constant 0 : index
      %c0_11 = arith.constant 0 : index
      %12 = vector.load %arg3[%c0_10, %c0_11] : memref<1x256xf32, #tpu.memory_space<vmem>>, vector<1x256xf32>
      %13 = vector.shape_cast %12 : vector<1x256xf32> to vector<1x256xf32>
      %14 = vector.broadcast %13 : vector<1x256xf32> to vector<4x256xf32>
      %c0_12 = arith.constant 0 : index
      %c0_13 = arith.constant 0 : index
      %15 = vector.load %arg7[%c0_12, %c0_13] : memref<4x256xf32, #tpu.memory_space<vmem>>, vector<4x256xf32>
      tpu.vector_store %arg7[%c0_12, %c0_13], %14 {strides = array<i32>} : memref<4x256xf32, #tpu.memory_space<vmem>>, vector<4x256xf32>,
    } else {
    }
    %c0 = arith.constant 0 : index
    %c0_1 = arith.constant 0 : index
    %3 = vector.load %arg7[%c0, %c0_1] : memref<4x256xf32, #tpu.memory_space<vmem>>, vector<4x256xf32>
    %c0_2 = arith.constant 0 : index
    %c0_3 = arith.constant 0 : index
    %4 = vector.load %arg1[%c0_2, %c0_3] : memref<4x512xbf16, #tpu.memory_space<vmem>>, vector<4x512xbf16>
    %c0_4 = arith.constant 0 : index
    %c0_5 = arith.constant 0 : index
    %5 = vector.load %arg2[%c0_4, %c0_5] : memref<512x256xbf16, #tpu.memory_space<vmem>>, vector<512x256xbf16>
    %cst = arith.constant dense<0.000000e+00> : vector<4x256xf32>
    %6 = tpu.matmul %4, %5, %cst {dimension_numbers = #tpu.dot_dimension_numbers<[1], [0], [0], [1], [0, 0, 1, 1], [], []>} : vector<4x512xbf16>, vector<512x256xbf16>, vector<4x256xf32> -> vector<4x256xf32>
    %7 = arith.addf %3, %6 : vector<4x256xf32>
    %c0_6 = arith.constant 0 : index
    %c0_7 = arith.constant 0 : index
    %8 = vector.load %arg7[%c0_6, %c0_7] : memref<4x256xf32, #tpu.memory_space<vmem>>, vector<4x256xf32>
    tpu.vector_store %arg7[%c0_6, %c0_7], %7 {strides = array<i32>} : memref<4x256xf32, #tpu.memory_space<vmem>>, vector<4x256xf32>,
    %c0_i32_8 = arith.constant 0 : i32
    %9 = arith.cmpi eq, %arg0, %c0_i32_8 : i32
    %10 = arith.extui %9 : i1 to i32
    %c0_i32_9 = arith.constant 0 : i32
    %11 = arith.cmpi ne, %10, %c0_i32_9 : i32
    scf.if %11 {
      %c0_10 = arith.constant 0 : index
      %c0_11 = arith.constant 0 : index
      %12 = vector.load %arg7[%c0_10, %c0_11] : memref<4x256xf32, #tpu.memory_space<vmem>>, vector<4x256xf32>
      %cst_12 = arith.constant 0.000000e+00 : f32
      %13 = vector.broadcast %cst_12 : f32 to vector<4x256xf32>
      %14 = arith.maximumf %12, %13 : vector<4x256xf32>
      %15 = arith.truncf %14 : vector<4x256xf32> to vector<4x256xbf16>
      %c0_13 = arith.constant 0 : index
      %c0_14 = arith.constant 0 : index
      %16 = vector.load %arg4[%c0_13, %c0_14] : memref<256x128xbf16, #tpu.memory_space<vmem>>, vector<256x128xbf16>
      %cst_15 = arith.constant dense<0.000000e+00> : vector<4x128xf32>
      %17 = tpu.matmul %15, %16, %cst_15 {dimension_numbers = #tpu.dot_dimension_numbers<[1], [0], [0], [1], [0, 0, 1, 1], [], []>} : vector<4x256xbf16>, vector<256x128xbf16>, vector<4x128xf32> -> vector<4x128xf32>
      %c0_16 = arith.constant 0 : index
      %c0_17 = arith.constant 0 : index
      %18 = vector.load %arg5[%c0_16, %c0_17] : memref<1x128xf32, #tpu.memory_space<vmem>>, vector<1x128xf32>
      %19 = vector.broadcast %18 : vector<1x128xf32> to vector<4x128xf32>
      %20 = arith.addf %17, %19 : vector<4x128xf32>
      %c0_18 = arith.constant 0 : index
      %c0_19 = arith.constant 0 : index
      %21 = vector.load %arg6[%c0_18, %c0_19] : memref<4x128xf32, #tpu.memory_space<vmem>>, vector<4x128xf32>
      tpu.vector_store %arg6[%c0_18, %c0_19], %20 {strides = array<i32>} : memref<4x128xf32, #tpu.memory_space<vmem>>, vector<4x128xf32>,
    } else {
    }
    return
  }
  func.func @transform_0(%arg0: i32) -> (i32, i32) {
    %c0_i32 = arith.constant 0 : i32
    %c0_i32_0 = arith.constant 0 : i32
    return %c0_i32, %arg0 : i32, i32
  }
  func.func @transform_1(%arg0: i32) -> (i32, i32) {
    %c0_i32 = arith.constant 0 : i32
    %c0_i32_0 = arith.constant 0 : i32
    return %arg0, %c0_i32 : i32, i32
  }
  func.func @transform_2(%arg0: i32) -> (i32, i32) {
    %c0_i32 = arith.constant 0 : i32
    %c0_i32_0 = arith.constant 0 : i32
    %c0_i32_1 = arith.constant 0 : i32
    return %c0_i32, %c0_i32_0 : i32, i32
  }
  func.func @transform_3(%arg0: i32) -> (i32, i32) {
    %c0_i32 = arith.constant 0 : i32
    %c0_i32_0 = arith.constant 0 : i32
    %c0_i32_1 = arith.constant 0 : i32
    return %c0_i32, %c0_i32_0 : i32, i32
  }
  func.func @transform_4(%arg0: i32) -> (i32, i32) {
    %c0_i32 = arith.constant 0 : i32
    %c0_i32_0 = arith.constant 0 : i32
    %c0_i32_1 = arith.constant 0 : i32
    return %c0_i32, %c0_i32_0 : i32, i32
  }
  func.func @transform_5(%arg0: i32) -> (i32, i32) {
    %c0_i32 = arith.constant 0 : i32
    %c0_i32_0 = arith.constant 0 : i32
    %c0_i32_1 = arith.constant 0 : i32
    return %c0_i32, %c0_i32_0 : i32, i32
  }
}

</mosaic_0001>

<bundles_post_ra>
// kernel: tpu_custom_call.1
= control target key start
LH: loop header
LB: loop body
LE: loop exit
PB: predicated region body
PF: predicated region fallthrough
CT: control target
= control target key end

     0   :  { %10 = vsyncpa [#allocation4], 0  ;;  %s1195_s0 = inlined_call_operand.hbm [shape: bf16[4,512], index: 0, kind: input, shape index: {}]   ;;  %s1196_s1 = inlined_call_operand.hbm [shape: bf16[512,256], index: 1, kind: input, shape index: {}]   ;;  %s1197_s2 = inlined_call_operand.vmem [shape: f32[1,256], index: 2, kind: input, shape index: {}]   ;;  %s1198_s3 = inlined_call_operand.hbm [shape: bf16[256,128], index: 3, kind: input, shape index: {}]   ;;  %s1199_s4 = inlined_call_operand.vmem [shape: f32[1,128], index: 4, kind: input, shape index: {}]   ;;  %s1200_s5 = inlined_call_operand.hbm [shape: f32[4,128], index: 5, kind: output, shape index: {}]  }
   0x1   :  { %11 = vsyncpa [#allocation7], 0 }
   0x2   :  { %12 = vsyncpa [#allocation5], 0  ;;  %s1097_s18 = smov [#allocation6]   ;;  %s1003_s22 = scalar_lea.hbm %s1196_s1, 8192 }
   0x3   :  { %s28_s19 = sshll.u32 %s1097_s18, 4  ;;  %p1004_p0 = scmp.ne.s32.totalorder %s1196_s1, %s1003_s22  ;;  %s29_s19 = int_to_ptr.vmem [resolvable:$true] %s28_s19 }
   0x4   :  { %p1007_p1 = scmp.lt.u32.totalorder %s1003_s22, %s1196_s1 }
   0x6   :  { %p1009_p2 = pnand %p1007_p1, %p1004_p0 }
   0x8   :  { %1012 = shalt.err (!%p1009_p2)
}
   0x9   :  { %s1013_s27 = scalar_lea.vmem %s29_s19, 8192  ;;  %p1018_p4 = scmp.lt.s32.totalorder %s29_s19, %s29_s19 }
   0xa   :  { %p1014_p3 = scmp.ne.s32.totalorder %s29_s19, %s1013_s27  ;;  %p1019_p5 = scmp.lt.s32.totalorder %s1013_s27, %s1013_s27 }
   0xc   :  { %p1020_p6 = por %p1019_p5, %p1018_p4 }
   0xe   :  { %p1021_p7 = pnand %p1020_p6, %p1014_p3 }
  0x10   :  { %1024 = shalt.err (!%p1021_p7)
}
  0x11   :  { %s1098_s28 = smov 128   ;;  %s1099_s29 = smov 8  }
  0x12   :  { %34 = dma.hbm_to_vmem [thread:$0]  %s1196_s1, 8192, %s29_s19, [#allocation7], %s1098_s28, %s1098_s28, %s1099_s29  }
  0x13   :  { %s1100_s7 = smov [#allocation3]   ;;  %s1101_s9 = smov [#allocation8]  }
  0x14   :  { %s19_s8 = sshll.u32 %s1100_s7, 4  ;;  %s42_s10 = sshll.u32 %s1101_s9, 4  ;;  %s20_s8 = int_to_ptr.vmem [resolvable:$true] %s19_s8  ;;  %s43_s10 = int_to_ptr.vmem [resolvable:$true] %s42_s10 }
  0x15   :  { %s1025_s13 = scalar_lea.hbm %s1195_s0, 128 }
  0x16   :  { %p1026_p8 = scmp.ne.s32.totalorder %s1195_s0, %s1025_s13  ;;  %p1029_p9 = scmp.lt.u32.totalorder %s1025_s13, %s1195_s0 }
  0x18   :  { %p1031_p10 = pnand %p1029_p9, %p1026_p8 }
  0x1a   :  { %1034 = shalt.err (!%p1031_p10)
}
  0x1b   :  { %s1035_s1 = scalar_lea.vmem %s20_s8, 128  ;;  %p1040_p12 = scmp.lt.s32.totalorder %s20_s8, %s20_s8 }
  0x1c   :  { %p1036_p11 = scmp.ne.s32.totalorder %s20_s8, %s1035_s1  ;;  %p1041_p13 = scmp.lt.s32.totalorder %s1035_s1, %s1035_s1 }
  0x1e   :  { %p1042_p0 = por %p1041_p13, %p1040_p12 }
  0x20   :  { %p1043_p1 = pnand %p1042_p0, %p1036_p11 }
  0x22   :  { %1046 = shalt.err (!%p1043_p1)
}
  0x23   :  { %22 = dma.hbm_to_vmem [thread:$0]  %s1195_s0, 128, %s20_s8, [#allocation4]  }
  0x24   :  { %s1047_s22 = scalar_lea.hbm %s1198_s3, 2048 }
  0x25   :  { %p1048_p2 = scmp.ne.s32.totalorder %s1198_s3, %s1047_s22  ;;  %p1051_p3 = scmp.lt.u32.totalorder %s1047_s22, %s1198_s3 }
  0x27   :  { %p1053_p4 = pnand %p1051_p3, %p1048_p2 }
  0x29   :  { %1056 = shalt.err (!%p1053_p4)
}
  0x2a   :  { %s1057_s27 = scalar_lea.vmem %s43_s10, 2048  ;;  %p1062_p6 = scmp.lt.s32.totalorder %s43_s10, %s43_s10 }
  0x2b   :  { %p1058_p5 = scmp.ne.s32.totalorder %s43_s10, %s1057_s27  ;;  %p1063_p7 = scmp.lt.s32.totalorder %s1057_s27, %s1057_s27 }
  0x2d   :  { %p1064_p8 = por %p1063_p7, %p1062_p6 }
  0x2f   :  { %p1065_p9 = pnand %p1064_p8, %p1058_p5 }
  0x31   :  { %1068 = shalt.err (!%p1065_p9)
}
  0x32   :  { %s1102_s0 = smov 64   ;;  %s1103_s28 = smov 4  }
  0x33   :  { %48 = dma.hbm_to_vmem [thread:$0]  %s1198_s3, 2048, %s43_s10, [#allocation7], %s1102_s0, %s1102_s0, %s1103_s28  }
  0x34   :  { %1091 = dma.done.wait [#allocation4], 128  }
  0x35   :  { %1092 = vsyncadd [#allocation4], 4294967168 }
  0x36   :  { %1093 = dma.done.wait [#allocation7], 10240  }
  0x37   :  { %1094 = vsyncadd [#allocation7], 4294957056  ;;  %v890_v0 = vld [vmem:[#allocation6 + $0x4] ss:$8 sps:$4 sm:$0xff]   ;;  %v894_v2 = vld [vmem:[#allocation6] ss:$8 sps:$4 sm:$0xff]   ;;  %v67_v36 = vlaneseq }
  0x38   :  { %v892_v1 = vld [vmem:[#allocation6 + $0x104] ss:$8 sps:$4 sm:$0xff]   ;;  %486 = vmatprep.subr.bf16.mxu1 %v890_v0  ;;  %v895_v3 = vld [vmem:[#allocation6 + $0x100] ss:$8 sps:$4 sm:$0xff]   ;;  %v896_v4 = vld [vmem:[#allocation6 + $0x14] ss:$8 sps:$4 sm:$0xff]  }
  0x39   :  { %527 = vmatprep.subr.bf16.mxu0 %v892_v1  ;;  %487 = vmatpush1.bf16.msra.mxu1 %v894_v2  ;;  %v898_v5 = vld [vmem:[#allocation6 + $0x114] ss:$8 sps:$4 sm:$0xff]   ;;  %v900_v6 = vld [vmem:[#allocation6 + $0x10] ss:$8 sps:$4 sm:$0xff]   ;;  %v902_v8 = vld [vmem:[#allocation6 + $0x24] ss:$8 sps:$4 sm:$0xff]  }
  0x3a   :  { %528 = vmatpush1.bf16.msra.mxu0 %v895_v3  ;;  %488 = vmatprep.subr.bf16.mxu1 %v896_v4  ;;  %v901_v7 = vld [vmem:[#allocation6 + $0x110] ss:$8 sps:$4 sm:$0xff]   ;;  %v904_v9 = vld [vmem:[#allocation6 + $0x124] ss:$8 sps:$4 sm:$0xff]   ;;  %v906_v10 = vld [vmem:[#allocation6 + $0x20] ss:$8 sps:$4 sm:$0xff]  }
  0x3b   :  { %529 = vmatprep.subr.bf16.mxu0 %v898_v5  ;;  %v907_v11 = vld [vmem:[#allocation6 + $0x120] ss:$8 sps:$4 sm:$0xff]   ;;  %v908_v12 = vld [vmem:[#allocation6 + $0x34] ss:$8 sps:$4 sm:$0xff]   ;;  %v912_v14 = vld [vmem:[#allocation6 + $0x30] ss:$8 sps:$4 sm:$0xff]  }
  0x3c   :  { %v910_v13 = vld [vmem:[#allocation6 + $0x134] ss:$8 sps:$4 sm:$0xff]   ;;  %v913_v15 = vld [vmem:[#allocation6 + $0x130] ss:$8 sps:$4 sm:$0xff]   ;;  %v914_v16 = vld [vmem:[#allocation6 + $0x44] ss:$8 sps:$4 sm:$0xff]  }
  0x3d   :  { %489 = vmatpush1.bf16.msra.mxu1 %v900_v6  ;;  %v916_v17 = vld [vmem:[#allocation6 + $0x144] ss:$8 sps:$4 sm:$0xff]   ;;  %v918_v18 = vld [vmem:[#allocation6 + $0x40] ss:$8 sps:$4 sm:$0xff]   ;;  %v920_v20 = vld [vmem:[#allocation6 + $0x54] ss:$8 sps:$4 sm:$0xff]  }
  0x3e   :  { %530 = vmatpush1.bf16.msra.mxu0 %v901_v7  ;;  %490 = vmatprep.subr.bf16.mxu1 %v902_v8  ;;  %v919_v19 = vld [vmem:[#allocation6 + $0x140] ss:$8 sps:$4 sm:$0xff]   ;;  %v922_v21 = vld [vmem:[#allocation6 + $0x154] ss:$8 sps:$4 sm:$0xff]   ;;  %v924_v22 = vld [vmem:[#allocation6 + $0x50] ss:$8 sps:$4 sm:$0xff]  }
  0x3f   :  { %531 = vmatprep.subr.bf16.mxu0 %v904_v9  ;;  %v925_v23 = vld [vmem:[#allocation6 + $0x150] ss:$8 sps:$4 sm:$0xff]   ;;  %v926_v24 = vld [vmem:[#allocation6 + $0x64] ss:$8 sps:$4 sm:$0xff]   ;;  %v930_v26 = vld [vmem:[#allocation6 + $0x60] ss:$8 sps:$4 sm:$0xff]  }
  0x40   :  { %v928_v25 = vld [vmem:[#allocation6 + $0x164] ss:$8 sps:$4 sm:$0xff]   ;;  %v931_v27 = vld [vmem:[#allocation6 + $0x160] ss:$8 sps:$4 sm:$0xff]   ;;  %v932_v28 = vld [vmem:[#allocation6 + $0x74] ss:$8 sps:$4 sm:$0xff]  }
  0x41   :  { %491 = vmatpush1.bf16.msra.mxu1 %v906_v10  ;;  %v934_v29 = vld [vmem:[#allocation6 + $0x174] ss:$8 sps:$4 sm:$0xff]   ;;  %v936_v30 = vld [vmem:[#allocation6 + $0x70] ss:$8 sps:$4 sm:$0xff]   ;;  %v938_v32 = vld [vmem:[#allocation6 + $0x84] ss:$8 sps:$4 sm:$0xff]  }
  0x42   :  { %532 = vmatpush1.bf16.msra.mxu0 %v907_v11  ;;  %492 = vmatprep.subr.bf16.mxu1 %v908_v12  ;;  %v937_v31 = vld [vmem:[#allocation6 + $0x170] ss:$8 sps:$4 sm:$0xff]   ;;  %v940_v33 = vld [vmem:[#allocation6 + $0x184] ss:$8 sps:$4 sm:$0xff]   ;;  %v942_v34 = vld [vmem:[#allocation6 + $0x80] ss:$8 sps:$4 sm:$0xff]  }
  0x43   :  { %533 = vmatprep.subr.bf16.mxu0 %v910_v13  ;;  %v943_v35 = vld [vmem:[#allocation6 + $0x180] ss:$8 sps:$4 sm:$0xff]   ;;  %v1104_v37 = vmov 1983009808   ;;  %v944_v39 = vld [vmem:[#allocation6 + $0x94] ss:$8 sps:$4 sm:$0xff]  }
  0x44   :  { %v147_v38 = vunpack.c.l.s4 %v1104_v37  ;;  %v946_v40 = vld [vmem:[#allocation6 + $0x194] ss:$8 sps:$4 sm:$0xff]   ;;  %v948_v41 = vld [vmem:[#allocation6 + $0x90] ss:$8 sps:$4 sm:$0xff]   ;;  %v1172_v42 = vshrl.u32 %v67_v36, 7  ;;  %v987_v12 = vld [vmem:[#allocation8 + $0x40] sm:$0xff]  }
  0x45   :  { %493 = vmatpush1.bf16.msra.mxu1 %v912_v14  ;;  %v949_v44 = vld [vmem:[#allocation6 + $0x190] ss:$8 sps:$4 sm:$0xff]   ;;  %v950_v45 = vld [vmem:[#allocation6 + $0xa4] ss:$8 sps:$4 sm:$0xff]   ;;  %v954_v47 = vld [vmem:[#allocation6 + $0xa0] ss:$8 sps:$4 sm:$0xff]  }
  0x46   :  { %534 = vmatpush1.bf16.msra.mxu0 %v913_v15  ;;  %494 = vmatprep.subr.bf16.mxu1 %v914_v16  ;;  %v148_v43 = vunpack.c.0.s8 %v147_v38  ;;  %v952_v46 = vld [vmem:[#allocation6 + $0x1a4] ss:$8 sps:$4 sm:$0xff]   ;;  %v955_v48 = vld [vmem:[#allocation6 + $0x1a0] ss:$8 sps:$4 sm:$0xff]   ;;  %v956_v50 = vld [vmem:[#allocation6 + $0xb4] ss:$8 sps:$4 sm:$0xff]  }
  0x47   :  { %535 = vmatprep.subr.bf16.mxu0 %v916_v17  ;;  %v958_v51 = vld [vmem:[#allocation6 + $0x1b4] ss:$8 sps:$4 sm:$0xff]   ;;  %v960_v52 = vld [vmem:[#allocation6 + $0xb0] ss:$8 sps:$4 sm:$0xff]   ;;  %v962_v57 = vld [vmem:[#allocation6 + $0xc4] ss:$8 sps:$4 sm:$0xff]  }
  0x48   :  { %v151_v49 = vsub.s32 %v148_v43, %v1172_v42  ;;  %v79_v53 = vld [vmem:[#allocation3] sm:$0xff]  ;;  %v964_v58 = vld [vmem:[#allocation6 + $0x1c4] ss:$8 sps:$4 sm:$0xff]   ;;  %v966_v61 = vld [vmem:[#allocation6 + $0xc0] ss:$8 sps:$4 sm:$0xff]   ;;  %s1105_s8 = smov [#allocation9]  }
  0x49   :  { %495 = vmatpush1.bf16.msra.mxu1 %v918_v18  ;;  %v961_v54 = vld [vmem:[#allocation6 + $0x1b0] ss:$8 sps:$4 sm:$0xff]   ;;  %v145_v56 = vcombine.high %v79_v53, %v79_v53  ;;  %v967_v62 = vld [vmem:[#allocation6 + $0x1c0] ss:$8 sps:$4 sm:$0xff]   ;;  %v968_v0 = vld [vmem:[#allocation6 + $0xd4] ss:$8 sps:$4 sm:$0xff]  }
  0x4a   :  { %536 = vmatpush1.bf16.msra.mxu0 %v919_v19  ;;  %496 = vmatprep.subr.bf16.mxu1 %v920_v20  ;;  %v152_v55 = vrot.slane %v79_v53, %v151_v49  ;;  %v970_v1 = vld [vmem:[#allocation6 + $0x1d4] ss:$8 sps:$4 sm:$0xff]   ;;  %v972_v2 = vld [vmem:[#allocation6 + $0xd0] ss:$8 sps:$4 sm:$0xff]   ;;  %v974_v4 = vld [vmem:[#allocation6 + $0xe4] ss:$8 sps:$4 sm:$0xff]  }
  0x4b   :  { %537 = vmatprep.subr.bf16.mxu0 %v922_v21  ;;  %v159_v60 = vrot.slane %v145_v56, %v151_v49  ;;  %v973_v3 = vld [vmem:[#allocation6 + $0x1d0] ss:$8 sps:$4 sm:$0xff]   ;;  %v976_v5 = vld [vmem:[#allocation6 + $0x1e4] ss:$8 sps:$4 sm:$0xff]   ;;  %v978_v6 = vld [vmem:[#allocation6 + $0xe0] ss:$8 sps:$4 sm:$0xff]  }
  0x4c   :  { %v160_v59 = vcombine.high %v152_v55, %v152_v55  ;;  %v979_v7 = vld [vmem:[#allocation6 + $0x1e0] ss:$8 sps:$4 sm:$0xff]   ;;  %v980_v8 = vld [vmem:[#allocation6 + $0xf4] ss:$8 sps:$4 sm:$0xff]   ;;  %v984_v10 = vld [vmem:[#allocation6 + $0xf0] ss:$8 sps:$4 sm:$0xff]  }
  0x4d   :  { %497 = vmatpush1.bf16.msra.mxu1 %v924_v22  ;;  %v161_v63 = vcombine.high %v159_v60, %v159_v60  ;;  %v982_v9 = vld [vmem:[#allocation6 + $0x1f4] ss:$8 sps:$4 sm:$0xff]   ;;  %v985_v11 = vld [vmem:[#allocation6 + $0x1f0] ss:$8 sps:$4 sm:$0xff]   ;;  %v988_v13 = vld [vmem:[#allocation8] sm:$0xff]   ;;  %s766_s9 = sshll.u32 %s1105_s8, 4  ;;  %s767_s9 = int_to_ptr.vmem [resolvable:$true] %s766_s9 }
  0x4e   :  { %538 = vmatpush1.bf16.msra.mxu0 %v925_v23  ;;  %498 = vmatprep.subr.bf16.mxu1 %v926_v24  ;;  %v989_v14 = vld [vmem:[#allocation8 + $0x48] sm:$0xff]   ;;  %v991_v16 = vld [vmem:[#allocation8 + $0x50] sm:$0xff]   ;;  %v993_v18 = vld [vmem:[#allocation8 + $0x58] sm:$0xff]   ;;  %s1069_s10 = scalar_lea.vmem %s767_s9, 64  ;;  %p1074_p11 = scmp.lt.s32.totalorder %s767_s9, %s767_s9 }
  0x4f   :  { %539 = vmatprep.subr.bf16.mxu0 %v928_v25  ;;  %518 = vmatprep.mubr.bf16.mxu1 %v160_v59  ;;  %v990_v15 = vld [vmem:[#allocation8 + $0x8] sm:$0xff]   ;;  %v992_v17 = vld [vmem:[#allocation8 + $0x10] sm:$0xff]   ;;  %v994_v19 = vld [vmem:[#allocation8 + $0x18] sm:$0xff]   ;;  %p1070_p10 = scmp.ne.s32.totalorder %s767_s9, %s1069_s10  ;;  %p1075_p12 = scmp.lt.s32.totalorder %s1069_s10, %s1069_s10 }
  0x50   :  { %559 = vmatprep.mubr.bf16.mxu0 %v161_v63  ;;  %v995_v20 = vld [vmem:[#allocation8 + $0x60] sm:$0xff]   ;;  %v997_v22 = vld [vmem:[#allocation8 + $0x68] sm:$0xff]   ;;  %v999_v24 = vld [vmem:[#allocation8 + $0x70] sm:$0xff]  }
  0x51   :  { %499 = vmatpush1.bf16.msra.mxu1 %v930_v26  ;;  %v996_v21 = vld [vmem:[#allocation8 + $0x20] sm:$0xff]   ;;  %v998_v23 = vld [vmem:[#allocation8 + $0x28] sm:$0xff]   ;;  %v1000_v25 = vld [vmem:[#allocation8 + $0x30] sm:$0xff]   ;;  %p1076_p13 = por %p1075_p12, %p1074_p11 }
  0x52   :  { %540 = vmatpush1.bf16.msra.mxu0 %v931_v27  ;;  %500 = vmatprep.subr.bf16.mxu1 %v932_v28  ;;  %v1001_v26 = vld [vmem:[#allocation8 + $0x78] sm:$0xff]   ;;  %v69_v28 = vsub.s32 0, %v1172_v42 }
  0x53   :  { %541 = vmatprep.subr.bf16.mxu0 %v934_v29  ;;  %v1002_v27 = vld [vmem:[#allocation8 + $0x38] sm:$0xff]   ;;  %v73_v29 = vsub.s32 1, %v1172_v42  ;;  %p1077_p0 = pnand %p1076_p13, %p1070_p10 }
  0x55   :  { %501 = vmatpush1.bf16.msra.mxu1 %v936_v30  ;;  %v65_v30 = vld [vmem:[%s1197_s2] sm:$0x3] }
  0x56   :  { %542 = vmatpush1.bf16.msra.mxu0 %v937_v31  ;;  %502 = vmatprep.subr.bf16.mxu1 %v938_v32  ;;  %v70_v31 = vrot.slane %v65_v30, %v69_v28  ;;  %v74_v32 = vrot.slane %v65_v30, %v73_v29 }
  0x57   :  { %543 = vmatprep.subr.bf16.mxu0 %v940_v33 }
  0x58   :  { %v75_v38 = vcombine.low %v70_v31, %v74_v32 }
  0x59   :  { %503 = vmatpush1.bf16.msra.mxu1 %v942_v34 }
  0x5a   :  { %544 = vmatpush1.bf16.msra.mxu0 %v943_v35  ;;  %504 = vmatprep.subr.bf16.mxu1 %v944_v39 }
  0x5b   :  { %545 = vmatprep.subr.bf16.mxu0 %v946_v40 }
  0x5d   :  { %505 = vmatpush1.bf16.msra.mxu1 %v948_v41 }
  0x5e   :  { %546 = vmatpush1.bf16.msra.mxu0 %v949_v44  ;;  %506 = vmatprep.subr.bf16.mxu1 %v950_v45 }
  0x5f   :  { %547 = vmatprep.subr.bf16.mxu0 %v952_v46 }
  0x61   :  { %507 = vmatpush1.bf16.msra.mxu1 %v954_v47 }
  0x62   :  { %548 = vmatpush1.bf16.msra.mxu0 %v955_v48  ;;  %508 = vmatprep.subr.bf16.mxu1 %v956_v50 }
  0x63   :  { %549 = vmatprep.subr.bf16.mxu0 %v958_v51  ;;  %v840_v51 = vld [vmem:[%s1199_s4] ss:$0 sm:$0xff] }
  0x65   :  { %509 = vmatpush1.bf16.msra.mxu1 %v960_v52 }
  0x66   :  { %550 = vmatpush1.bf16.msra.mxu0 %v961_v54  ;;  %510 = vmatprep.subr.bf16.mxu1 %v962_v57 }
  0x67   :  { %551 = vmatprep.subr.bf16.mxu0 %v964_v58 }
  0x69   :  { %511 = vmatpush1.bf16.msra.mxu1 %v966_v61 }
  0x6a   :  { %552 = vmatpush1.bf16.msra.mxu0 %v967_v62  ;;  %512 = vmatprep.subr.bf16.mxu1 %v968_v0 }
  0x6b   :  { %553 = vmatprep.subr.bf16.mxu0 %v970_v1 }
  0x6d   :  { %513 = vmatpush1.bf16.msra.mxu1 %v972_v2 }
  0x6e   :  { %554 = vmatpush1.bf16.msra.mxu0 %v973_v3  ;;  %514 = vmatprep.subr.bf16.mxu1 %v974_v4 }
  0x6f   :  { %555 = vmatprep.subr.bf16.mxu0 %v976_v5 }
  0x71   :  { %515 = vmatpush1.bf16.msra.mxu1 %v978_v6 }
  0x72   :  { %556 = vmatpush1.bf16.msra.mxu0 %v979_v7  ;;  %516 = vmatprep.subr.bf16.mxu1 %v980_v8 }
  0x73   :  { %557 = vmatprep.subr.bf16.mxu0 %v982_v9 }
  0x75   :  { %517 = vmatpush1.bf16.msra.mxu1 %v984_v10 }
  0x76   :  { %558 = vmatpush1.bf16.msra.mxu0 %v985_v11  ;;  %857 = vmatprep.subr.bf16.mxu1 %v987_v12 }
  0x78   :  { %519 = vmatmul.mubr.bf16.vlgmr.msra.gmra.mrb[0].mxu1 %v152_v55 }
  0x79   :  { %560 = vmatmul.mubr.bf16.vlgmr.msra.gmra.mrb[0].mxu0 %v159_v60  ;;  %858 = vmatpush3.bf16.msra.mxu1 %v988_v13 }
  0x7a   :  { %859 = vmatprep.subr.bf16.mxu1 %v989_v14 }
  0x7d   :  { %860 = vmatpush3.bf16.msra.mxu1 %v990_v15 }
  0x7e   :  { %861 = vmatprep.subr.bf16.mxu1 %v991_v16 }
  0x81   :  { %862 = vmatpush3.bf16.msra.mxu1 %v992_v17 }
  0x82   :  { %863 = vmatprep.subr.bf16.mxu1 %v993_v18 }
  0x85   :  { %864 = vmatpush3.bf16.msra.mxu1 %v994_v19 }
  0x86   :  { %865 = vmatprep.subr.bf16.mxu1 %v995_v20 }
  0x89   :  { %866 = vmatpush3.bf16.msra.mxu1 %v996_v21 }
  0x8a   :  { %867 = vmatprep.subr.bf16.mxu1 %v997_v22 }
  0x8d   :  { %868 = vmatpush3.bf16.msra.mxu1 %v998_v23 }
  0x8e   :  { %869 = vmatprep.subr.bf16.mxu1 %v999_v24 }
  0x91   :  { %870 = vmatpush3.bf16.msra.mxu1 %v1000_v25 }
  0x92   :  { %871 = vmatprep.subr.bf16.mxu1 %v1001_v26 }
  0x95   :  { %872 = vmatpush3.bf16.msra.mxu1 %v1002_v27 }
 0x14b   :  { %v520_v33 = vpop.f32.mrb[0].mxu1 }
 0x14c   :  { %v561_v34 = vpop.f32.mrb[0].mxu0  ;;  %v522_v36 = vpop.f32.mrb[1].mxu1 }
 0x14d   :  { %v562_v35 = vadd.f32 %v561_v34, %v520_v33  ;;  %v563_v37 = vpop.f32.mrb[1].mxu0  ;;  %v524_v40 = vpop.f32.mrb[2].mxu1 }
 0x14e   :  { %v564_v39 = vadd.f32 %v563_v37, %v522_v36  ;;  %v565_v41 = vpop.f32.mrb[2].mxu0  ;;  %v525_v43 = vpop.f32.mrb[3].mxu1 }
 0x14f   :  { %v566_v44 = vpop.f32.mrb[3].mxu0 }
 0x150   :  { %v570_v45 = vcombine.low %v562_v35, %v564_v39 }
 0x152   :  { %v572_v46 = vadd.f32 %v570_v45, %v75_v38 }
 0x154   :  { %v578_v42 = vmax.f32 %v572_v46, 0.0 }
 0x156   :  { %v580_v47 = vcombine.high %v578_v42, %v578_v42  ;;  %v582_v49 = vpack.c.bf16 %v578_v42, %v578_v42 }
 0x158   :  { %v583_v48 = vpack.c.bf16 %v580_v47, %v580_v47 }
 0x15a   :  { %751 = vmatprep.mubr.bf16.mxu1 %v583_v48 }
 0x15b   :  { %752 = vmatmul.mubr.bf16.vlgmr.msra.gmra.mrb[4].mxu1 %v582_v49 }
 0x22e   :  { %v873_v50 = vpop.f32.mrb[4].mxu1 }
 0x22f   :  { %v874_v52 = vpop.f32.mrb[5].mxu1 }
 0x230   :  { %v875_v53 = vadd.f32 %v874_v52, %v873_v50  ;;  %v876_v54 = vpop.f32.mrb[6].mxu1 }
 0x231   :  { %v877_v55 = vpop.f32.mrb[7].mxu1 }
 0x232   :  { %v754_v56 = vadd.f32 %v875_v53, %v840_v51 }
 0x234   :  { %759 = vst [vmem:[#allocation9] sm:$0xf] %v754_v56 }
 0x235   :  { %1080 = shalt.err (!%p1077_p0)
}
 0x236   :  { %s1081_s4 = scalar_lea.hbm %s1200_s5, 64 }
 0x237   :  { %p1082_p1 = scmp.ne.s32.totalorder %s1200_s5, %s1081_s4  ;;  %p1085_p2 = scmp.lt.u32.totalorder %s1081_s4, %s1200_s5 }
 0x239   :  { %p1087_p3 = pnand %p1085_p2, %p1082_p1 }
 0x23b   :  { %1090 = shalt.err (!%p1087_p3)
}
 0x23c   :  { %769 = dma.vmem_to_hbm [thread:$0]  %s767_s9, 64, %s1200_s5, [#allocation5]  }
 0x23d   :  { %1095 = dma.done.wait [#allocation5], 64  }
 0x23e   :  { %1096 = vsyncadd [#allocation5], 4294967232 }
 0x23f   :  { %773 = vsyncpa [#allocation4], 1 }
 0x240   :  { %774 = vsyncpa [#allocation7], 1 }
 0x241   :  { %775 = vsyncpa [#allocation5], 1 }

</bundles_post_ra>
